<compile_context>
chip_gen: v7x
topology: tpu7x:2x2x1
jax: 0.10.0
libtpu: 0.0.40
codegen_flags: <defaults>
</compile_context>

<pallas_src>
import jax
import jax.numpy as jnp
from jax.experimental import pallas as pl
from jax.experimental.pallas import tpu as pltpu

LANE = 128  # vreg lane width


def mlp_kernel(params_ref, x_ref, o_ref):
    # params_ref (SMEM, f32[10]):
    #   [w1_00, w1_01, w1_10, w1_11, b1, w2_00, w2_01, w2_10, w2_11, b2]
    # x_ref / o_ref: (2, R, 128) -- feature-major, batch dense over (sublane, lane).
    x0 = x_ref[0].astype(jnp.float32)  # (R, 128)
    x1 = x_ref[1].astype(jnp.float32)  # (R, 128)

    # fc1 + sigmoid:  h_j = sigmoid(x0 * W1[j,0] + x1 * W1[j,1] + b1)
    b1 = params_ref[4]
    h0 = jax.nn.sigmoid(x0 * params_ref[0] + x1 * params_ref[1] + b1)
    h1 = jax.nn.sigmoid(x0 * params_ref[2] + x1 * params_ref[3] + b1)

    # fc2 + sigmoid:  y_j = sigmoid(h0 * W2[j,0] + h1 * W2[j,1] + b2)
    b2 = params_ref[9]
    y0 = jax.nn.sigmoid(h0 * params_ref[5] + h1 * params_ref[6] + b2)
    y1 = jax.nn.sigmoid(h0 * params_ref[7] + h1 * params_ref[8] + b2)

    # Full-slab, unmasked stores (rows multiple of 8, lane-dense 128).
    o_ref[0] = y0.astype(o_ref.dtype)
    o_ref[1] = y1.astype(o_ref.dtype)


def net_forward(x, w1, b1, w2, b2, tb=131072):
    """x: (B, 2) row-major. Weights PyTorch-style (out_features, in_features)."""
    B, F = x.shape
    assert F == 2 and w1.shape == (2, 2) and w2.shape == (2, 2)

    # Batch tile must be a multiple of 8*128 = 1024 so each tile is a whole
    # number of fully packed (8, 128) vregs per feature row.
    tb = max(1024, (tb // 1024) * 1024)
    if B <= tb:
        tb = max(1024, pl.cdiv(B, 1024) * 1024)
    Bp = pl.cdiv(B, tb) * tb
    rows = tb // LANE

    # Feature-major, batch-padded layout; the trailing reshape to
    # (2, Bp//128, 128) is a pure metadata reshape in row-major HBM.
    xT = jnp.zeros((2, Bp), x.dtype).at[:, :B].set(x.T)
    x3 = xT.reshape(2, Bp // LANE, LANE)

    # All 10 parameters as SMEM scalars.  The original module's biases have
    # shape (1,), i.e. the same bias value broadcasts over both output
    # features -- kept exactly as in the PyTorch spec.
    params = jnp.concatenate(
        [w1.reshape(-1), b1.reshape(-1), w2.reshape(-1), b2.reshape(-1)]
    ).astype(jnp.float32)

    out3 = pl.pallas_call(
        mlp_kernel,
        out_shape=jax.ShapeDtypeStruct((2, Bp // LANE, LANE), x.dtype),
        grid_spec=pltpu.PrefetchScalarGridSpec(
            num_scalar_prefetch=0,
            grid=(Bp // tb,),
            in_specs=[
                pl.BlockSpec(memory_space=pltpu.MemorySpace.SMEM),   # params (resident)
                pl.BlockSpec((2, rows, LANE), lambda i: (0, i, 0)),  # x batch tiles
            ],
            out_specs=pl.BlockSpec((2, rows, LANE), lambda i: (0, i, 0)),
        ),
        compiler_params=pltpu.CompilerParams(
            # Batch tiles are independent -> shard across v7x's 2 TensorCores.
            dimension_semantics=("parallel",),
        ),
    )(params, x3)

    return out3.reshape(2, Bp)[:, :B].T


if __name__ == "__main__":
    # Deterministic parameters exactly as in the PyTorch module's __init__.
    w1 = jnp.array([[0.15, 0.20], [0.25, 0.30]], dtype=jnp.float32)
    b1 = jnp.array([0.35], dtype=jnp.float32)
    w2 = jnp.array([[0.40, 0.45], [0.50, 0.55]], dtype=jnp.float32)
    b2 = jnp.array([0.60], dtype=jnp.float32)

    # Small deterministic input consistent with Linear(2, 2): batch=2, features=2.
    key = jax.random.PRNGKey(0)
    x = jax.random.normal(key, (2, 2), dtype=jnp.float32)

    out = jax.block_until_ready(net_forward(x, w1, b1, w2, b2))

    # Pure-JAX reference (PyTorch semantics: x @ W.T + b, bias broadcast).
    ref = jax.nn.sigmoid(jax.nn.sigmoid(x @ w1.T + b1) @ w2.T + b2)
    assert out.shape == ref.shape, (out.shape, ref.shape)
    assert jnp.allclose(out, ref, atol=1e-6), (out, ref)
    print("KERNEL_OK")
</pallas_src>

<mosaic_0001>
module attributes {stable_mosaic.version = 11 : i64} {
  func.func @mlp_kernel(%arg0: i32, %arg1: memref<10xf32, #tpu.memory_space<smem>>, %arg2: memref<2x8x128xf32, #tpu.memory_space<vmem>>, %arg3: memref<2x8x128xf32, #tpu.memory_space<vmem>>) attributes {dimension_semantics = [#tpu.dimension_semantics<parallel>], iteration_bounds = array<i64: 1>, scalar_prefetch = 0 : i64, scratch_operands = 0 : i64, tpu.core_type = #tpu.core_type<tc>, window_params = [{transform_indices = @transform_0, window_bounds = array<i64: 10>}, {transform_indices = @transform_1, window_bounds = array<i64: 2, 8, 128>}, {transform_indices = @transform_2, window_bounds = array<i64: 2, 8, 128>}]} {
    %c0 = arith.constant 0 : index
    %c0_0 = arith.constant 0 : index
    %c0_1 = arith.constant 0 : index
    %0 = vector.load %arg2[%c0, %c0_0, %c0_1] : memref<2x8x128xf32, #tpu.memory_space<vmem>>, vector<1x8x128xf32>
    %1 = vector.shape_cast %0 : vector<1x8x128xf32> to vector<8x128xf32>
    %c1 = arith.constant 1 : index
    %c0_2 = arith.constant 0 : index
    %c0_3 = arith.constant 0 : index
    %2 = vector.load %arg2[%c1, %c0_2, %c0_3] : memref<2x8x128xf32, #tpu.memory_space<vmem>>, vector<1x8x128xf32>
    %3 = vector.shape_cast %2 : vector<1x8x128xf32> to vector<8x128xf32>
    %c4 = arith.constant 4 : index
    %4 = memref.load %arg1[%c4] : memref<10xf32, #tpu.memory_space<smem>>
    %c0_4 = arith.constant 0 : index
    %5 = memref.load %arg1[%c0_4] : memref<10xf32, #tpu.memory_space<smem>>
    %6 = vector.broadcast %5 : f32 to vector<8x128xf32>
    %7 = arith.mulf %1, %6 : vector<8x128xf32>
    %c1_5 = arith.constant 1 : index
    %8 = memref.load %arg1[%c1_5] : memref<10xf32, #tpu.memory_space<smem>>
    %9 = vector.broadcast %8 : f32 to vector<8x128xf32>
    %10 = arith.mulf %3, %9 : vector<8x128xf32>
    %11 = arith.addf %7, %10 : vector<8x128xf32>
    %12 = vector.broadcast %4 : f32 to vector<8x128xf32>
    %13 = arith.addf %11, %12 : vector<8x128xf32>
    %14 = arith.negf %13 : vector<8x128xf32>
    %15 = math.exp %14 : vector<8x128xf32>
    %cst = arith.constant 1.000000e+00 : f32
    %16 = vector.broadcast %cst : f32 to vector<8x128xf32>
    %17 = arith.addf %16, %15 : vector<8x128xf32>
    %18 = arith.divf %16, %17 : vector<8x128xf32>
    %c2 = arith.constant 2 : index
    %19 = memref.load %arg1[%c2] : memref<10xf32, #tpu.memory_space<smem>>
    %20 = vector.broadcast %19 : f32 to vector<8x128xf32>
    %21 = arith.mulf %1, %20 : vector<8x128xf32>
    %c3 = arith.constant 3 : index
    %22 = memref.load %arg1[%c3] : memref<10xf32, #tpu.memory_space<smem>>
    %23 = vector.broadcast %22 : f32 to vector<8x128xf32>
    %24 = arith.mulf %3, %23 : vector<8x128xf32>
    %25 = arith.addf %21, %24 : vector<8x128xf32>
    %26 = vector.broadcast %4 : f32 to vector<8x128xf32>
    %27 = arith.addf %25, %26 : vector<8x128xf32>
    %28 = arith.negf %27 : vector<8x128xf32>
    %29 = math.exp %28 : vector<8x128xf32>
    %cst_6 = arith.constant 1.000000e+00 : f32
    %30 = vector.broadcast %cst_6 : f32 to vector<8x128xf32>
    %31 = arith.addf %30, %29 : vector<8x128xf32>
    %32 = arith.divf %30, %31 : vector<8x128xf32>
    %c9 = arith.constant 9 : index
    %33 = memref.load %arg1[%c9] : memref<10xf32, #tpu.memory_space<smem>>
    %c5 = arith.constant 5 : index
    %34 = memref.load %arg1[%c5] : memref<10xf32, #tpu.memory_space<smem>>
    %35 = vector.broadcast %34 : f32 to vector<8x128xf32>
    %36 = arith.mulf %18, %35 : vector<8x128xf32>
    %c6 = arith.constant 6 : index
    %37 = memref.load %arg1[%c6] : memref<10xf32, #tpu.memory_space<smem>>
    %38 = vector.broadcast %37 : f32 to vector<8x128xf32>
    %39 = arith.mulf %32, %38 : vector<8x128xf32>
    %40 = arith.addf %36, %39 : vector<8x128xf32>
    %41 = vector.broadcast %33 : f32 to vector<8x128xf32>
    %42 = arith.addf %40, %41 : vector<8x128xf32>
    %43 = arith.negf %42 : vector<8x128xf32>
    %44 = math.exp %43 : vector<8x128xf32>
    %cst_7 = arith.constant 1.000000e+00 : f32
    %45 = vector.broadcast %cst_7 : f32 to vector<8x128xf32>
    %46 = arith.addf %45, %44 : vector<8x128xf32>
    %47 = arith.divf %45, %46 : vector<8x128xf32>
    %c7 = arith.constant 7 : index
    %48 = memref.load %arg1[%c7] : memref<10xf32, #tpu.memory_space<smem>>
    %49 = vector.broadcast %48 : f32 to vector<8x128xf32>
    %50 = arith.mulf %18, %49 : vector<8x128xf32>
    %c8 = arith.constant 8 : index
    %51 = memref.load %arg1[%c8] : memref<10xf32, #tpu.memory_space<smem>>
    %52 = vector.broadcast %51 : f32 to vector<8x128xf32>
    %53 = arith.mulf %32, %52 : vector<8x128xf32>
    %54 = arith.addf %50, %53 : vector<8x128xf32>
    %55 = vector.broadcast %33 : f32 to vector<8x128xf32>
    %56 = arith.addf %54, %55 : vector<8x128xf32>
    %57 = arith.negf %56 : vector<8x128xf32>
    %58 = math.exp %57 : vector<8x128xf32>
    %cst_8 = arith.constant 1.000000e+00 : f32
    %59 = vector.broadcast %cst_8 : f32 to vector<8x128xf32>
    %60 = arith.addf %59, %58 : vector<8x128xf32>
    %61 = arith.divf %59, %60 : vector<8x128xf32>
    %c0_9 = arith.constant 0 : index
    %c0_10 = arith.constant 0 : index
    %c0_11 = arith.constant 0 : index
    %62 = vector.load %arg3[%c0_9, %c0_10, %c0_11] : memref<2x8x128xf32, #tpu.memory_space<vmem>>, vector<1x8x128xf32>
    %63 = vector.shape_cast %62 : vector<1x8x128xf32> to vector<8x128xf32>
    %64 = vector.shape_cast %47 : vector<8x128xf32> to vector<1x8x128xf32>
    tpu.vector_store %arg3[%c0_9, %c0_10, %c0_11], %64 {strides = array<i32>} : memref<2x8x128xf32, #tpu.memory_space<vmem>>, vector<1x8x128xf32>,
    %c1_12 = arith.constant 1 : index
    %c0_13 = arith.constant 0 : index
    %c0_14 = arith.constant 0 : index
    %65 = vector.load %arg3[%c1_12, %c0_13, %c0_14] : memref<2x8x128xf32, #tpu.memory_space<vmem>>, vector<1x8x128xf32>
    %66 = vector.shape_cast %65 : vector<1x8x128xf32> to vector<8x128xf32>
    %67 = vector.shape_cast %61 : vector<8x128xf32> to vector<1x8x128xf32>
    tpu.vector_store %arg3[%c1_12, %c0_13, %c0_14], %67 {strides = array<i32>} : memref<2x8x128xf32, #tpu.memory_space<vmem>>, vector<1x8x128xf32>,
    return
  }
  func.func @transform_0(%arg0: i32) -> i32 {
    %c0_i32 = arith.constant 0 : i32
    %c0_i32_0 = arith.constant 0 : i32
    return %c0_i32 : i32
  }
  func.func @transform_1(%arg0: i32) -> (i32, i32, i32) {
    %c0_i32 = arith.constant 0 : i32
    %c0_i32_0 = arith.constant 0 : i32
    %c0_i32_1 = arith.constant 0 : i32
    return %c0_i32, %arg0, %c0_i32_0 : i32, i32, i32
  }
  func.func @transform_2(%arg0: i32) -> (i32, i32, i32) {
    %c0_i32 = arith.constant 0 : i32
    %c0_i32_0 = arith.constant 0 : i32
    %c0_i32_1 = arith.constant 0 : i32
    return %c0_i32, %arg0, %c0_i32_0 : i32, i32, i32
  }
}

</mosaic_0001>

<bundles_post_ra>
// kernel: tpu_custom_call.1
= control target key start
LH: loop header
LB: loop body
LE: loop exit
PB: predicated region body
PF: predicated region fallthrough
CT: control target
= control target key end

     0   :  { %7 = vsyncpa [#allocation5], 0  ;;  %s277_s0 = inlined_call_operand.hbm [shape: f32[10], index: 0, kind: input, shape index: {}]   ;;  %s278_s1 = inlined_call_operand.hbm [shape: f32[2,8,128], index: 1, kind: input, shape index: {}]   ;;  %s279_s2 = inlined_call_operand.hbm [shape: f32[2,8,128], index: 2, kind: output, shape index: {}]  }
   0x1   :  { %8 = vsyncpa [#allocation3], 0 }
   0x2   :  { %9 = vsyncpa [#allocation4], 0  ;;  %s155_s11 = scalar_lea.hbm %s277_s0, 16 }
   0x3   :  { %p156_p0 = scmp.ne.s32.totalorder %s277_s0, %s155_s11  ;;  %p159_p1 = scmp.lt.u32.totalorder %s155_s11, %s277_s0 }
   0x5   :  { %p161_p2 = pnand %p159_p1, %p156_p0 }
   0x7   :  { %164 = shalt.err (!%p161_p2)
}
   0x8   :  { %s215_s16 = smov [#allocation2]   ;;  %s216_s19 = smov [#allocation6]  }
   0x9   :  { %17 = dma.hbm_to_smem %s277_s0, 16, %s215_s16, [#allocation5]  }
   0xa   :  { %s23_s20 = sshll.u32 %s216_s19, 4  ;;  %s165_s23 = scalar_lea.hbm %s278_s1, 256  ;;  %s24_s20 = int_to_ptr.vmem [resolvable:$true] %s23_s20 }
   0xb   :  { %p166_p3 = scmp.ne.s32.totalorder %s278_s1, %s165_s23  ;;  %p169_p4 = scmp.lt.u32.totalorder %s165_s23, %s278_s1 }
   0xd   :  { %p171_p5 = pnand %p169_p4, %p166_p3 }
   0xf   :  { %174 = shalt.err (!%p171_p5)
}
  0x10   :  { %s175_s28 = scalar_lea.vmem %s24_s20, 256  ;;  %p180_p7 = scmp.lt.s32.totalorder %s24_s20, %s24_s20 }
  0x11   :  { %p176_p6 = scmp.ne.s32.totalorder %s24_s20, %s175_s28  ;;  %p181_p8 = scmp.lt.s32.totalorder %s175_s28, %s175_s28 }
  0x13   :  { %p182_p9 = por %p181_p8, %p180_p7 }
  0x15   :  { %p183_p10 = pnand %p182_p9, %p176_p6 }
  0x17   :  { %186 = shalt.err (!%p183_p10)
}
  0x18   :  { %s217_s0 = smov 128   ;;  %s218_s29 = smov 8  }
  0x19   :  { %29 = dma.hbm_to_vmem [thread:$0]  %s278_s1, 256, %s24_s20, [#allocation3], %s217_s0, %s217_s0, %s218_s29  }
  0x1a   :  { %209 = dma.done.wait [#allocation5], 16  }
  0x1b   :  { %210 = vsyncadd [#allocation5], 4294967280 }
  0x1c   :  { %211 = dma.done.wait [#allocation3], 256  }
  0x1d   :  { %212 = vsyncadd [#allocation3], 4294967040 }
  0x1e   :  { %36 = sfence }
  0x1f   :  { %s121_s4 = sld [smem:[#allocation2 + $0x4]]  ;;  %s41_s5 = sld [smem:[#allocation2]]  ;;  %v37_v0 = vld [vmem:[#allocation6] sm:$0xff]  ;;  %v39_v1 = vld [vmem:[#allocation6 + $0x8] sm:$0xff] }
  0x20   :  { %s122_s6 = sld [smem:[#allocation2 + $0x1]]  ;;  %s124_s7 = sld [smem:[#allocation2 + $0x2]] }
  0x21   :  { %s125_s8 = sld [smem:[#allocation2 + $0x3]]  ;;  %s128_s1 = sld [smem:[#allocation2 + $0x5]] }
  0x22   :  { %s131_s9 = sld [smem:[#allocation2 + $0x7]]  ;;  %s129_s10 = sld [smem:[#allocation2 + $0x6]] }
  0x23   :  { %s132_s11 = sld [smem:[#allocation2 + $0x8]]  ;;  %s127_s12 = sld [smem:[#allocation2 + $0x9]] }
  0x24   :  { %s219_s13 = smov [#allocation7]  }
  0x25   :  { %v42_v2 = vstv %s41_s5  ;;  %v48_v9 = vstv %s121_s4  ;;  %s108_s14 = sshll.u32 %s219_s13, 4  ;;  %s109_s14 = int_to_ptr.vmem [resolvable:$true] %s108_s14 }
  0x26   :  { %v43_v3 = vmul.f32 %v42_v2, %v37_v0  ;;  %v45_v4 = vstv %s122_s6  ;;  %v57_v5 = vstv %s124_s7  ;;  %s187_s15 = scalar_lea.vmem %s109_s14, 256  ;;  %p192_p12 = scmp.lt.s32.totalorder %s109_s14, %s109_s14 }
  0x27   :  { %v46_v6 = vmul.f32 %v45_v4, %v39_v1  ;;  %v58_v7 = vmul.f32 %v57_v5, %v37_v0  ;;  %v60_v8 = vstv %s125_s8  ;;  %v72_v21 = vstv %s128_s1  ;;  %p188_p11 = scmp.ne.s32.totalorder %s109_s14, %s187_s15  ;;  %p193_p13 = scmp.lt.s32.totalorder %s187_s15, %s187_s15 }
  0x28   :  { %v61_v10 = vmul.f32 %v60_v8, %v39_v1  ;;  %v87_v22 = vstv %s131_s9  ;;  %v75_v23 = vstv %s129_s10 }
  0x29   :  { %v47_v11 = vadd.f32 %v46_v6, %v43_v3  ;;  %v90_v24 = vstv %s132_s11  ;;  %v78_v31 = vstv %s127_s12  ;;  %p194_p0 = por %p193_p13, %p192_p12 }
  0x2a   :  { %v62_v12 = vadd.f32 %v61_v10, %v58_v7 }
  0x2b   :  { %v49_v13 = vadd.f32 %v48_v9, %v47_v11  ;;  %p195_p1 = pnand %p194_p0, %p188_p11 }
  0x2c   :  { %v63_v14 = vadd.f32 %v62_v12, %v48_v9 }
  0x2d   :  { %v123_v15 = vmul.f32 -1.442695, %v49_v13 }
  0x2e   :  { %v126_v16 = vmul.f32 -1.442695, %v63_v14 }
  0x2f   :  { %139 = vpow2.f32 %v123_v15 }
  0x30   :  { %141 = vpow2.f32 %v126_v16 }
  0x39   :  { %v140_v17 = vpop.eup %139 }
  0x3a   :  { %v142_v18 = vpop.eup %141  ;;  %v53_v19 = vadd.f32 1.0, %v140_v17 }
  0x3b   :  { %v67_v20 = vadd.f32 1.0, %v142_v18 }
  0x3c   :  { %143 = vrcp.f32 %v53_v19 }
  0x3d   :  { %145 = vrcp.f32 %v67_v20 }
  0x46   :  { %v144_v25 = vpop.eup %143 }
  0x47   :  { %v146_v26 = vpop.eup %145  ;;  %v73_v27 = vmul.f32 %v144_v25, %v72_v21  ;;  %v88_v28 = vmul.f32 %v144_v25, %v87_v22 }
  0x48   :  { %v76_v29 = vmul.f32 %v146_v26, %v75_v23  ;;  %v91_v30 = vmul.f32 %v146_v26, %v90_v24 }
  0x4a   :  { %v77_v32 = vadd.f32 %v76_v29, %v73_v27  ;;  %v92_v33 = vadd.f32 %v91_v30, %v88_v28 }
  0x4c   :  { %v79_v34 = vadd.f32 %v78_v31, %v77_v32  ;;  %v93_v35 = vadd.f32 %v92_v33, %v78_v31 }
  0x4e   :  { %v130_v36 = vmul.f32 -1.442695, %v79_v34  ;;  %v133_v37 = vmul.f32 -1.442695, %v93_v35 }
  0x50   :  { %147 = vpow2.f32 %v130_v36 }
  0x51   :  { %149 = vpow2.f32 %v133_v37 }
  0x5a   :  { %v148_v38 = vpop.eup %147 }
  0x5b   :  { %v150_v39 = vpop.eup %149  ;;  %v83_v40 = vadd.f32 1.0, %v148_v38 }
  0x5c   :  { %v97_v41 = vadd.f32 1.0, %v150_v39 }
  0x5d   :  { %151 = vrcp.f32 %v83_v40 }
  0x5e   :  { %153 = vrcp.f32 %v97_v41 }
  0x67   :  { %v152_v42 = vpop.eup %151 }
  0x68   :  { %v154_v43 = vpop.eup %153  ;;  %100 = vst [vmem:[#allocation7] sm:$0xff] %v152_v42 }
  0x69   :  { %102 = vst [vmem:[#allocation7 + $0x8] sm:$0xff] %v154_v43 }
  0x6a   :  { %198 = shalt.err (!%p195_p1)
}
  0x6b   :  { %s199_s18 = scalar_lea.hbm %s279_s2, 256 }
  0x6c   :  { %p200_p2 = scmp.ne.s32.totalorder %s279_s2, %s199_s18  ;;  %p203_p3 = scmp.lt.u32.totalorder %s199_s18, %s279_s2 }
  0x6e   :  { %p205_p4 = pnand %p203_p3, %p200_p2 }
  0x70   :  { %208 = shalt.err (!%p205_p4)
}
  0x71   :  { %114 = dma.vmem_to_hbm [thread:$0]  %s109_s14, 256, %s279_s2, [#allocation4], %s217_s0, %s217_s0, %s218_s29  }
  0x72   :  { %213 = dma.done.wait [#allocation4], 256  }
  0x73   :  { %214 = vsyncadd [#allocation4], 4294967040 }
  0x74   :  { %118 = vsyncpa [#allocation3], 1 }
  0x75   :  { %119 = vsyncpa [#allocation4], 1 }
  0x76   :  { %120 = vsyncpa [#allocation5], 1 }

</bundles_post_ra>
